<compile_context>
chip_gen: v5e
topology: v5e:2x2
jax: 0.10.0
libtpu: 0.0.40
codegen_flags: <defaults>
</compile_context>

<pallas_src>
from functools import partial

import jax
import jax.numpy as jnp
from jax.experimental import pallas as pl
from jax.experimental.pallas import tpu as pltpu

LANES = 128
ACC_ROWS = 64                    # (64,128) f32 accumulator = 8 independent vregs
MAX_TILE_ROWS = 8192             # row cap (multiple of ACC_ROWS)
MAX_TILE_BYTES = 4 * 1024 * 1024  # per-input pipeline-buffer budget


def _num_tensorcores() -> int:
    """Best-effort TensorCore count per chip (2 on v7x-class, else 1)."""
    try:
        info = pltpu.get_tpu_info()
        for attr in ("num_cores", "core_count", "num_tensorcores", "tensorcore_count"):
            v = getattr(info, attr, None)
            if v is None:
                continue
            try:
                v = int(v)
            except Exception:
                continue
            if v >= 1:
                return min(v, 2)
    except Exception:
        pass
    try:
        kind = jax.devices()[0].device_kind.lower()
        if "v7" in kind:
            return 2
    except Exception:
        pass
    return 1


def _sq_err_kernel(yh_ref, y_ref, out_ref, *, tile_rows, steps, rows_valid, needs_mask):
    """Accumulates sum((y_hat - y)^2) for one split into a (64, 128) f32 slab."""
    i = pl.program_id(1)  # sequential reduction axis within this split

    @pl.when(i == 0)
    def _():
        out_ref[...] = jnp.zeros_like(out_ref)

    # In-register upcast: HBM traffic stays at the input dtype width.
    d = yh_ref[...].astype(jnp.float32) - y_ref[...].astype(jnp.float32)

    if needs_mask:
        # Ragged tail tile (or a clamped duplicate tile): zero out logical rows
        # that lie beyond the real array before squaring.  Handles stale VMEM
        # in the partial block safely (jnp.where never propagates the masked
        # branch, even if it is NaN/inf).
        blk = pl.program_id(0) * steps + i
        row0 = blk * tile_rows
        local = jax.lax.broadcasted_iota(jnp.int32, (tile_rows, LANES), 0)
        d = jnp.where(row0 + local < rows_valid, d, 0.0)

    dd = d * d
    # Fold (tile_rows, 128) into the wide (64, 128) accumulator with pure VPU
    # adds; the cross-lane reduce to a scalar happens once, outside the kernel.
    out_ref[...] += dd.reshape(tile_rows // ACC_ROWS, ACC_ROWS, LANES).sum(axis=0)


def rmse_loss(y_hat: jax.Array, y: jax.Array, eps: float = 1e-6,
              *, num_splits=None, max_tile_rows: int = MAX_TILE_ROWS) -> jax.Array:
    """Equivalent of torch.sqrt(torch.nn.MSELoss()(y_hat, y) + eps) -> scalar."""
    assert y_hat.shape == y.shape, "RMSELoss expects matching shapes"
    total = int(y_hat.size)

    yh = jnp.ravel(y_hat)
    yv = jnp.ravel(y)

    # (a) Lane alignment: rare fallback when the element count is not a
    # multiple of 128.  Zero padding contributes 0; the mean divides by the
    # true `total`, so the result is exact.
    lane_pad = (-total) % LANES
    if lane_pad:
        yh = jnp.pad(yh, (0, lane_pad))
        yv = jnp.pad(yv, (0, lane_pad))
    rows = (total + lane_pad) // LANES

    yh2d = yh.reshape(rows, LANES)
    yv2d = yv.reshape(rows, LANES)

    # (b) Tiny inputs: pad rows up to one 64-row accumulator block (cheap).
    if rows < ACC_ROWS:
        row_pad = ACC_ROWS - rows
        yh2d = jnp.pad(yh2d, ((0, row_pad), (0, 0)))
        yv2d = jnp.pad(yv2d, ((0, row_pad), (0, 0)))
        rows = ACC_ROWS

    # Tile sizing: a multiple of ACC_ROWS, never larger than the array
    # (so every block is in bounds), capped by a per-buffer byte budget.
    itemsize = max(jnp.dtype(y_hat.dtype).itemsize, jnp.dtype(y.dtype).itemsize)
    byte_cap_rows = max(ACC_ROWS,
                        (MAX_TILE_BYTES // (LANES * itemsize)) // ACC_ROWS * ACC_ROWS)
    cap = min(int(max_tile_rows), MAX_TILE_ROWS, byte_cap_rows)
    cap = max(ACC_ROWS, (cap // ACC_ROWS) * ACC_ROWS)
    tile_rows = min(cap, (rows // ACC_ROWS) * ACC_ROWS)

    nblocks = -(-rows // tile_rows)
    splits = int(num_splits) if num_splits is not None else _num_tensorcores()
    splits = max(1, min(splits, nblocks))
    steps = -(-nblocks // splits)

    needs_clamp = splits * steps != nblocks          # uneven core split
    needs_mask = needs_clamp or (nblocks * tile_rows != rows)  # ragged tail

    if needs_clamp:
        def in_idx(p, i):
            # Duplicate iterations re-read the last real block; the in-kernel
            # row mask zeroes their contribution.
            return (jnp.minimum(p * steps + i, nblocks - 1), 0)
    else:
        def in_idx(p, i):
            return (p * steps + i, 0)

    kernel = partial(_sq_err_kernel, tile_rows=tile_rows, steps=steps,
                     rows_valid=rows, needs_mask=needs_mask)

    # Explicit scoped-VMEM budget: enough for 2 inputs x 2 buffers plus f32
    # intermediates, capped at 48 MiB (fits under every generation's physical
    # VMEM, including v7x's 64 MiB; above v5e's 16 MiB default).
    tile_bytes_f32 = tile_rows * LANES * 4
    vmem_limit = int(min(48 * 1024 * 1024, max(8 * 1024 * 1024, 10 * tile_bytes_f32)))

    partials = pl.pallas_call(
        kernel,
        out_shape=jax.ShapeDtypeStruct((splits * ACC_ROWS, LANES), jnp.float32),
        grid_spec=pltpu.PrefetchScalarGridSpec(
            num_scalar_prefetch=0,
            grid=(splits, steps),
            in_specs=[pl.BlockSpec((tile_rows, LANES), in_idx),
                      pl.BlockSpec((tile_rows, LANES), in_idx)],
            out_specs=pl.BlockSpec((ACC_ROWS, LANES), lambda p, i: (p, 0)),
        ),
        compiler_params=pltpu.CompilerParams(
            dimension_semantics=("parallel", "arbitrary"),
            vmem_limit_bytes=vmem_limit),
    )(yh2d, yv2d)

    mse = jnp.sum(partials, dtype=jnp.float32) / jnp.float32(total)
    return jnp.sqrt(mse + jnp.float32(eps))


if __name__ == "__main__":
    key = jax.random.PRNGKey(0)
    k1, k2 = jax.random.split(key)

    def _ref(a, b, eps=1e-6):
        diff = a.astype(jnp.float32) - b.astype(jnp.float32)
        return jnp.sqrt(jnp.mean(diff * diff) + jnp.float32(eps))

    # 1) NCHW-style synthetic input (tiny: single tile, unmasked path).
    shape = (2, 4, 16, 16)
    y_hat = jax.random.normal(k1, shape, dtype=jnp.float32)
    y = jax.random.normal(k2, shape, dtype=jnp.float32)
    out1 = rmse_loss(y_hat, y, eps=1e-6)
    jax.block_until_ready(out1)
    assert jnp.allclose(out1, _ref(y_hat, y), rtol=1e-5, atol=1e-6), (out1, _ref(y_hat, y))

    # 2) Ragged row count (264 rows -> 2 steps, masked partial tail tile).
    a = jax.random.normal(k1, (33792,), dtype=jnp.float32)
    b = jax.random.normal(k2, (33792,), dtype=jnp.float32)
    out2 = rmse_loss(a, b)
    assert jnp.allclose(out2, _ref(a, b), rtol=1e-5, atol=1e-6), (out2, _ref(a, b))

    # 3) Forced small tiles + 2-way split with an odd block count: exercises
    #    the clamped index_map, the parallel grid axis and the mask together.
    out3 = rmse_loss(a, b, num_splits=2, max_tile_rows=128)
    assert jnp.allclose(out3, _ref(a, b), rtol=1e-5, atol=1e-6), (out3, _ref(a, b))

    # 4) bf16 inputs, even 2-way split, multi-step unmasked accumulation path.
    c = jax.random.normal(k1, (256, 128), dtype=jnp.bfloat16)
    d = jax.random.normal(k2, (256, 128), dtype=jnp.bfloat16)
    out4 = rmse_loss(c, d, num_splits=2, max_tile_rows=64)
    assert jnp.allclose(out4, _ref(c, d), rtol=1e-2, atol=1e-3), (out4, _ref(c, d))

    # 5) Element count not a multiple of 128 (lane-pad fallback path).
    e = jax.random.normal(k1, (1000,), dtype=jnp.float32)
    f = jax.random.normal(k2, (1000,), dtype=jnp.float32)
    out5 = rmse_loss(e, f)
    assert jnp.allclose(out5, _ref(e, f), rtol=1e-5, atol=1e-6), (out5, _ref(e, f))

    jax.block_until_ready((out1, out2, out3, out4, out5))
    print("KERNEL_OK")
</pallas_src>

<mosaic_0001>
module attributes {stable_mosaic.version = 11 : i64} {
  func.func @_sq_err_kernel(%arg0: i32, %arg1: i32, %arg2: memref<64x128xf32, #tpu.memory_space<vmem>>, %arg3: memref<64x128xf32, #tpu.memory_space<vmem>>, %arg4: memref<64x128xf32, #tpu.memory_space<vmem>>) attributes {dimension_semantics = [#tpu.dimension_semantics<parallel>, #tpu.dimension_semantics<arbitrary>], iteration_bounds = array<i64: 1, 1>, scalar_prefetch = 0 : i64, scratch_operands = 0 : i64, tpu.core_type = #tpu.core_type<tc>, window_params = [{transform_indices = @transform_0, window_bounds = array<i64: 64, 128>}, {transform_indices = @transform_1, window_bounds = array<i64: 64, 128>}, {transform_indices = @transform_2, window_bounds = array<i64: 64, 128>}]} {
    %c0_i32 = arith.constant 0 : i32
    %0 = arith.cmpi eq, %arg1, %c0_i32 : i32
    %1 = arith.extui %0 : i1 to i32
    %c0_i32_0 = arith.constant 0 : i32
    %2 = arith.cmpi ne, %1, %c0_i32_0 : i32
    scf.if %2 {
      %cst_8 = arith.constant 0.000000e+00 : f32
      %12 = vector.broadcast %cst_8 : f32 to vector<64x128xf32>
      %c0_9 = arith.constant 0 : index
      %c0_10 = arith.constant 0 : index
      %13 = vector.load %arg4[%c0_9, %c0_10] : memref<64x128xf32, #tpu.memory_space<vmem>>, vector<64x128xf32>
      tpu.vector_store %arg4[%c0_9, %c0_10], %12 {strides = array<i32>} : memref<64x128xf32, #tpu.memory_space<vmem>>, vector<64x128xf32>,
    } else {
    }
    %c0 = arith.constant 0 : index
    %c0_1 = arith.constant 0 : index
    %3 = vector.load %arg2[%c0, %c0_1] : memref<64x128xf32, #tpu.memory_space<vmem>>, vector<64x128xf32>
    %c0_2 = arith.constant 0 : index
    %c0_3 = arith.constant 0 : index
    %4 = vector.load %arg3[%c0_2, %c0_3] : memref<64x128xf32, #tpu.memory_space<vmem>>, vector<64x128xf32>
    %5 = arith.subf %3, %4 : vector<64x128xf32>
    %6 = arith.mulf %5, %5 : vector<64x128xf32>
    %c0_4 = arith.constant 0 : index
    %c0_5 = arith.constant 0 : index
    %7 = vector.load %arg4[%c0_4, %c0_5] : memref<64x128xf32, #tpu.memory_space<vmem>>, vector<64x128xf32>
    %8 = vector.shape_cast %6 : vector<64x128xf32> to vector<1x64x128xf32>
    %cst = arith.constant dense<0.000000e+00> : vector<64x128xf32>
    %9 = vector.multi_reduction <add>, %8, %cst [0] : vector<1x64x128xf32> to vector<64x128xf32>
    %10 = arith.addf %7, %9 : vector<64x128xf32>
    %c0_6 = arith.constant 0 : index
    %c0_7 = arith.constant 0 : index
    %11 = vector.load %arg4[%c0_6, %c0_7] : memref<64x128xf32, #tpu.memory_space<vmem>>, vector<64x128xf32>
    tpu.vector_store %arg4[%c0_6, %c0_7], %10 {strides = array<i32>} : memref<64x128xf32, #tpu.memory_space<vmem>>, vector<64x128xf32>,
    return
  }
  func.func @transform_0(%arg0: i32, %arg1: i32) -> (i32, i32) {
    %c1_i32 = arith.constant 1 : i32
    %0 = arith.muli %arg0, %c1_i32 : i32
    %1 = arith.addi %0, %arg1 : i32
    %c0_i32 = arith.constant 0 : i32
    %c0_i32_0 = arith.constant 0 : i32
    return %1, %c0_i32 : i32, i32
  }
  func.func @transform_1(%arg0: i32, %arg1: i32) -> (i32, i32) {
    %c1_i32 = arith.constant 1 : i32
    %0 = arith.muli %arg0, %c1_i32 : i32
    %1 = arith.addi %0, %arg1 : i32
    %c0_i32 = arith.constant 0 : i32
    %c0_i32_0 = arith.constant 0 : i32
    return %1, %c0_i32 : i32, i32
  }
  func.func @transform_2(%arg0: i32, %arg1: i32) -> (i32, i32) {
    %c0_i32 = arith.constant 0 : i32
    %c0_i32_0 = arith.constant 0 : i32
    return %arg0, %c0_i32 : i32, i32
  }
}

</mosaic_0001>

<bundles_post_ra>
// kernel: tpu_custom_call.1
= control target key start
LH: loop header
LB: loop body
LE: loop exit
PB: predicated region body
PF: predicated region fallthrough
CT: control target
= control target key end

     0   :  { %7 = vsyncpa [#allocation3], 0  ;;  %s274_s0 = inlined_call_operand.hbm [shape: f32[64,128], index: 0, kind: input, shape index: {}]   ;;  %s275_s1 = inlined_call_operand.hbm [shape: f32[64,128], index: 1, kind: input, shape index: {}]   ;;  %s276_s2 = inlined_call_operand.hbm [shape: f32[64,128], index: 2, kind: output, shape index: {}]  }
   0x1   :  { %8 = vsyncpa [#allocation6], 0 }
   0x2   :  { %9 = vsyncpa [#allocation4], 0  ;;  %s18_s11 = sshll.u32 %s274_s0, 4  ;;  %s236_s12 = smov [#allocation2]   ;;  %s19_s11 = int_to_ptr.hbm [resolvable:$true] %s18_s11 }
   0x3   :  { %s20_s13 = sshll.u32 %s236_s12, 4  ;;  %s35_s16 = sshll.u32 %s275_s1, 4  ;;  %s21_s13 = int_to_ptr.vmem [resolvable:$true] %s20_s13  ;;  %s36_s16 = int_to_ptr.hbm [resolvable:$true] %s35_s16 }
   0x4   :  { %s237_s17 = smov 128   ;;  %s238_s18 = smov 8  }
   0x5   :  { %26 = dma.hbm_to_vmem [thread:$0]  %s19_s11, 1024, %s21_s13, [#allocation3], %s237_s17, %s237_s17, %s238_s18  }
   0x6   :  { %s239_s19 = smov [#allocation5]  }
   0x7   :  { %s37_s20 = sshll.u32 %s239_s19, 4  ;;  %s38_s20 = int_to_ptr.vmem [resolvable:$true] %s37_s20 }
   0x8   :  { %43 = dma.hbm_to_vmem [thread:$0]  %s36_s16, 1024, %s38_s20, [#allocation6], %s237_s17, %s237_s17, %s238_s18  }
   0x9   :  { %230 = dma.done.wait [#allocation3], 1024  }
   0xa   :  { %231 = vsyncadd [#allocation3], 4294966272 }
   0xb   :  { %232 = dma.done.wait [#allocation6], 1024  }
   0xc   :  { %233 = vsyncadd [#allocation6], 4294966272  ;;  %v68_v0 = vld [vmem:[#allocation2] sm:$0xff]  ;;  %v69_v2 = vld [vmem:[#allocation2 + $0x8] sm:$0xff]  ;;  %s240_s0 = smov [#allocation7]   ;;  %s138_s23 = sshll.u32 %s276_s2, 4  ;;  %s139_s23 = int_to_ptr.hbm [resolvable:$true] %s138_s23 }
   0xd   :  { %v76_v1 = vld [vmem:[#allocation5] sm:$0xff]  ;;  %v77_v4 = vld [vmem:[#allocation5 + $0x8] sm:$0xff]  ;;  %v70_v5 = vld [vmem:[#allocation2 + $0x10] sm:$0xff]  ;;  %s136_s1 = sshll.u32 %s240_s0, 4  ;;  %s137_s1 = int_to_ptr.vmem [resolvable:$true] %s136_s1 }
   0xe   :  { %v84_v3 = vsub.f32 %v68_v0, %v76_v1  ;;  %v78_v6 = vld [vmem:[#allocation5 + $0x10] sm:$0xff]  ;;  %v85_v7 = vsub.f32 %v69_v2, %v77_v4  ;;  %v71_v9 = vld [vmem:[#allocation2 + $0x18] sm:$0xff]  ;;  %v72_v11 = vld [vmem:[#allocation2 + $0x20] sm:$0xff] }
   0xf   :  { %v86_v8 = vsub.f32 %v70_v5, %v78_v6  ;;  %v79_v10 = vld [vmem:[#allocation5 + $0x18] sm:$0xff]  ;;  %v80_v14 = vld [vmem:[#allocation5 + $0x20] sm:$0xff]  ;;  %v73_v15 = vld [vmem:[#allocation2 + $0x28] sm:$0xff] }
  0x10   :  { %v92_v12 = vmul.f32 %v84_v3, %v84_v3  ;;  %v87_v13 = vsub.f32 %v71_v9, %v79_v10  ;;  %v81_v16 = vld [vmem:[#allocation5 + $0x28] sm:$0xff]  ;;  %v93_v17 = vmul.f32 %v85_v7, %v85_v7  ;;  %v88_v19 = vsub.f32 %v72_v11, %v80_v14  ;;  %v74_v21 = vld [vmem:[#allocation2 + $0x30] sm:$0xff]  ;;  %v75_v23 = vld [vmem:[#allocation2 + $0x38] sm:$0xff] }
  0x11   :  { %v94_v18 = vmul.f32 %v86_v8, %v86_v8  ;;  %v89_v20 = vsub.f32 %v73_v15, %v81_v16  ;;  %v82_v22 = vld [vmem:[#allocation5 + $0x30] sm:$0xff]  ;;  %v83_v26 = vld [vmem:[#allocation5 + $0x38] sm:$0xff] }
  0x12   :  { %v95_v24 = vmul.f32 %v87_v13, %v87_v13  ;;  %v90_v25 = vsub.f32 %v74_v21, %v82_v22  ;;  %v96_v27 = vmul.f32 %v88_v19, %v88_v19  ;;  %124 = vst [vmem:[#allocation7] sm:$0xff] %v92_v12  ;;  %v91_v30 = vsub.f32 %v75_v23, %v83_v26 }
  0x13   :  { %v97_v28 = vmul.f32 %v89_v20, %v89_v20  ;;  %125 = vst [vmem:[#allocation7 + $0x8] sm:$0xff] %v93_v17 }
  0x14   :  { %v98_v29 = vmul.f32 %v90_v25, %v90_v25  ;;  %126 = vst [vmem:[#allocation7 + $0x10] sm:$0xff] %v94_v18  ;;  %v99_v31 = vmul.f32 %v91_v30, %v91_v30 }
  0x15   :  { %127 = vst [vmem:[#allocation7 + $0x18] sm:$0xff] %v95_v24 }
  0x16   :  { %128 = vst [vmem:[#allocation7 + $0x20] sm:$0xff] %v96_v27 }
  0x17   :  { %129 = vst [vmem:[#allocation7 + $0x28] sm:$0xff] %v97_v28 }
  0x18   :  { %130 = vst [vmem:[#allocation7 + $0x30] sm:$0xff] %v98_v29 }
  0x19   :  { %131 = vst [vmem:[#allocation7 + $0x38] sm:$0xff] %v99_v31 }
  0x1a   :  { %144 = dma.vmem_to_hbm [thread:$0]  %s137_s1, 1024, %s139_s23, [#allocation4], %s237_s17, %s237_s17, %s238_s18  }
  0x1b   :  { %234 = dma.done.wait [#allocation4], 1024  }
  0x1c   :  { %235 = vsyncadd [#allocation4], 4294966272 }
  0x1d   :  { %149 = vsyncpa [#allocation3], 1 }
  0x1e   :  { %150 = vsyncpa [#allocation6], 1 }
  0x1f   :  { %151 = vsyncpa [#allocation4], 1 }

</bundles_post_ra>
